<compile_context>
chip_gen: v7x
topology: tpu7x:2x2x1
jax: 0.10.0
libtpu: 0.0.40
codegen_flags: <defaults>
</compile_context>

<pallas_src>
import numpy as np
import jax
import jax.numpy as jnp
from jax import lax
from jax.experimental import pallas as pl
from jax.experimental.pallas import tpu as pltpu


def _round_up(x, m):
    return ((x + m - 1) // m) * m


# ----------------------------------------------------------------------------
# Fused Pallas kernel: LBS skinning (once, into VMEM scratch) + projection
# ----------------------------------------------------------------------------
def _smpl_fused_kernel(coeff_ref, amat_ref, vt_ref, bd_ref, w_ref,
                       sel_ref, wd_ref, out_ref, verts_ref):
    # coeff_ref : (B, Kp)          [betas | pose_feature], zero padded (resident)
    # amat_ref  : (12B, J)         row (4c+k)*B + b = A[b, :, c, k]    (resident)
    # vt_ref    : (1, 3*Vp)        template, coordinate folded into lanes
    # bd_ref    : (Kp, 3*Vp)       fused shape+pose blend dirs, bf16   (resident)
    # w_ref     : (J, Vp)          LBS weights, transposed             (resident)
    # sel_ref   : (Vp, 3*mt)       one-hot corner gather slab for this M tile
    # wd_ref    : (3, mt)          rows = [w2_0, w2_1, proj_dist]
    # out_ref   : (3B, mt)         projected simplified vertices (no transl)
    # verts_ref : (3B, Vp) scratch skinned vertices, persists across M tiles
    nb = coeff_ref.shape[0]
    vlen = w_ref.shape[1]            # Vp
    mt = out_ref.shape[1]            # m_tile

    # ---- LBS pass: run once, results stay VMEM-resident across the M grid ----
    @pl.when(pl.program_id(0) == 0)
    def _():
        coeff = coeff_ref[...].astype(jnp.bfloat16)                    # (B, Kp)
        # fused shape+pose blend offsets for x,y,z in ONE wide-N dot
        blend = jnp.dot(coeff, bd_ref[...],
                        preferred_element_type=jnp.float32)            # (B, 3Vp)
        vposed = vt_ref[...] + blend                                   # (B, 3Vp)
        vx = vposed[:, :vlen]
        vy = vposed[:, vlen:2 * vlen]
        vz = vposed[:, 2 * vlen:3 * vlen]
        # per-vertex 3x4 skinning transforms for all batches in one dot
        # (kept f32: tiny dot, and bf16 here would eat the error budget)
        t12 = jnp.dot(amat_ref[...], w_ref[...],
                      preferred_element_type=jnp.float32)              # (12B, Vp)
        outs = []
        for c in range(3):
            r = 4 * c * nb
            outs.append(t12[r:r + nb] * vx
                        + t12[r + nb:r + 2 * nb] * vy
                        + t12[r + 2 * nb:r + 3 * nb] * vz
                        + t12[r + 3 * nb:r + 4 * nb])                  # (B, Vp)
        verts_ref[...] = jnp.concatenate(outs, axis=0)                 # one store

    # ---- projection for this M tile (runs every grid step) ----
    v16 = verts_ref[...].astype(jnp.bfloat16)                          # (3B, Vp)
    # single bf16 x bf16 gather dot -> [c0 | c1 | c2] as 128-aligned lane slices
    g = jnp.dot(v16, sel_ref[...], preferred_element_type=jnp.float32)  # (3B,3mt)
    c0 = g[:, :mt]
    c1 = g[:, mt:2 * mt]
    c2 = g[:, 2 * mt:3 * mt]
    e1 = c1 - c0
    e2 = c2 - c0

    w0 = wd_ref[0:1, :]                                                # (1, mt)
    w1 = wd_ref[1:2, :]
    d = wd_ref[2:3, :]
    p = c0 + w0 * e1 + w1 * e2                                         # (3B, mt)

    e1x, e1y, e1z = e1[:nb], e1[nb:2 * nb], e1[2 * nb:3 * nb]
    e2x, e2y, e2z = e2[:nb], e2[nb:2 * nb], e2[2 * nb:3 * nb]
    nx = e1y * e2z - e1z * e2y                                         # (B, mt)
    ny = e1z * e2x - e1x * e2z
    nz = e1x * e2y - e1y * e2x
    s = d * lax.rsqrt(nx * nx + ny * ny + nz * nz + 1e-12)             # (B, mt)
    # stacked epilogue: one full-tile, lane-dense store
    out_ref[...] = p + jnp.concatenate([nx * s, ny * s, nz * s], axis=0)


def smpl_forward_pallas(coeff, amat, vt_k, bd_k, w_t, sel_k, wd_k, *, m_tile):
    B, Kp = coeff.shape
    J, Vp = w_t.shape
    Mp = wd_k.shape[1]
    grid_m = Mp // m_tile

    # VMEM budget derived from the actual tiling (resident operands + scratch
    # + double-buffered streamed tiles), with generous margin; fits v7x 64 MiB.
    resident = 4 * (B * Kp + 12 * B * J + 3 * Vp + J * Vp + 3 * B * Vp) \
        + 2 * Kp * 3 * Vp
    streamed = 2 * Vp * 3 * m_tile + 4 * 3 * m_tile + 4 * 3 * B * m_tile
    vmem_limit = int(min(max(4 * (resident + 2 * streamed), 16 << 20), 96 << 20))

    return pl.pallas_call(
        _smpl_fused_kernel,
        out_shape=jax.ShapeDtypeStruct((3 * B, Mp), jnp.float32),
        grid_spec=pltpu.PrefetchScalarGridSpec(
            num_scalar_prefetch=0,
            grid=(grid_m,),
            in_specs=[
                pl.BlockSpec((B, Kp), lambda m: (0, 0)),            # resident
                pl.BlockSpec((12 * B, J), lambda m: (0, 0)),        # resident
                pl.BlockSpec((1, 3 * Vp), lambda m: (0, 0)),        # resident
                pl.BlockSpec((Kp, 3 * Vp), lambda m: (0, 0)),       # resident
                pl.BlockSpec((J, Vp), lambda m: (0, 0)),            # resident
                pl.BlockSpec((Vp, 3 * m_tile), lambda m: (0, m)),   # streamed
                pl.BlockSpec((3, m_tile), lambda m: (0, m)),        # streamed
            ],
            out_specs=pl.BlockSpec((3 * B, m_tile), lambda m: (0, m)),
            scratch_shapes=[pltpu.VMEM((3 * B, Vp), jnp.float32)],
        ),
        # "arbitrary": the step-0 LBS init must run before all other steps
        # (megacore-parallel splitting would skip it on the second core).
        compiler_params=pltpu.CompilerParams(
            dimension_semantics=("arbitrary",),
            vmem_limit_bytes=vmem_limit),
    )(coeff, amat, vt_k, bd_k, w_t, sel_k, wd_k)


# ----------------------------------------------------------------------------
# Plain-JAX glue: Rodrigues + kinematic chain (tiny, sequential over J joints)
# ----------------------------------------------------------------------------
def batch_rodrigues(rot_vecs):
    n = rot_vecs.shape[0]
    angle = jnp.sqrt(jnp.sum((rot_vecs + 1e-8) ** 2, axis=1, keepdims=True))
    rot_dir = rot_vecs / angle
    cos = jnp.cos(angle)[:, :, None]
    sin = jnp.sin(angle)[:, :, None]
    rx, ry, rz = rot_dir[:, 0], rot_dir[:, 1], rot_dir[:, 2]
    zeros = jnp.zeros_like(rx)
    K = jnp.stack([zeros, -rz, ry, rz, zeros, -rx, -ry, rx, zeros],
                  axis=1).reshape(n, 3, 3)
    ident = jnp.eye(3, dtype=rot_vecs.dtype)[None]
    return ident + sin * K + (1.0 - cos) * jnp.matmul(K, K)


def batch_rigid_transform(rot_mats, joints, parents):
    # TODO(synk): kinematic-chain walk stays in plain JAX (J sequential 4x4s).
    B, J = joints.shape[:2]
    rel_joints = joints.at[:, 1:].add(-joints[:, parents[1:]])
    top = jnp.concatenate([rot_mats, rel_joints[..., None]], axis=3)
    bottom = jnp.broadcast_to(
        jnp.array([0.0, 0.0, 0.0, 1.0], dtype=joints.dtype), (B, J, 1, 4))
    transforms_mat = jnp.concatenate([top, bottom], axis=2)       # (B, J, 4, 4)
    chain = [transforms_mat[:, 0]]
    for i in range(1, J):
        chain.append(jnp.matmul(chain[parents[i]], transforms_mat[:, i]))
    transforms = jnp.stack(chain, axis=1)
    posed_joints = transforms[:, :, :3, 3]
    joints_hom = jnp.concatenate(
        [joints, jnp.zeros((B, J, 1), joints.dtype)], axis=2)[..., None]
    rel = transforms - jnp.pad(jnp.matmul(transforms, joints_hom),
                               ((0, 0), (0, 0), (0, 0), (3, 0)))
    return posed_joints, rel


# ----------------------------------------------------------------------------
# SMPLSimplified (Pallas version) with deterministic synthetic parameters
# ----------------------------------------------------------------------------
class SMPLSimplifiedPallas:
    def __init__(self, key, V=256, F=512, M=128, J=8, NB=8):
        self.V, self.F, self.M, self.J, self.NB = V, F, M, J, NB
        self.P = 9 * (J - 1)
        self.parents = np.array([-1, 0, 0, 0, 1, 2, 3, 4], dtype=np.int32)[:J]
        k = jax.random.split(key, 9)

        # SMPL-template parameters (synthetic stand-ins for the checkpoint)
        self.v_template = jax.random.uniform(k[0], (V, 3), jnp.float32, -1., 1.)
        self.shapedirs = 0.03 * jax.random.normal(k[1], (V, 3, NB), jnp.float32)
        self.posedirs = 0.01 * jax.random.normal(k[2], (self.P, V * 3),
                                                 jnp.float32)
        jr = jax.random.uniform(k[3], (J, V), jnp.float32, 0.0, 1.0)
        self.J_regressor = jr / jnp.sum(jr, axis=1, keepdims=True)
        self.lbs_weights = jax.nn.softmax(
            4.0 * jax.random.normal(k[4], (V, J), jnp.float32), axis=1)

        # SurfaceField / simplified-mesh buffers (normally precomputed offline
        # by o3d quadric decimation + SurfaceField.project_points).
        # TODO(synk): o3d decimation / project_points precompute runs offline.
        self.faces = jax.random.randint(k[5], (F, 3), 0, V)
        self.nearest_face_id = jax.random.randint(k[6], (M,), 0, F)
        self.weights_2d = jax.random.uniform(k[7], (M, 2), jnp.float32, 0., .5)
        self.proj_dist = 0.05 * jax.random.normal(k[8], (M,), jnp.float32)

        # --- lane-aligned padded sizes ---
        P = self.P
        K = NB + P
        self.Kp = _round_up(K, 128)                 # contraction dim padded
        self.Vp = _round_up(V, 128)
        self.m_tile = 128
        Mp = _round_up(M, self.m_tile)
        if Mp // self.m_tile < 2:                   # >=2 grid steps: DMA/compute
            Mp = 2 * self.m_tile                    # overlap (padding is cheap)
        self.Mp = Mp
        Kp, Vp = self.Kp, self.Vp
        padV, padM, padK = Vp - V, Mp - M, Kp - K

        # --- kernel-side parameter layouts ---
        # fused shape+pose blend dirs, coordinate folded into lanes, bf16
        sd_k = jnp.transpose(self.shapedirs, (1, 2, 0))                  # (3,NB,V)
        pd_k = jnp.transpose(self.posedirs.reshape(P, V, 3), (2, 0, 1))  # (3,P,V)
        bd = jnp.concatenate([sd_k, pd_k], axis=1)                       # (3,K,V)
        bd = jnp.pad(bd, ((0, 0), (0, padK), (0, padV)))                 # (3,Kp,Vp)
        self.bd_k = jnp.transpose(bd, (1, 0, 2)).reshape(
            Kp, 3 * Vp).astype(jnp.bfloat16)                             # (Kp,3Vp)
        self.vt_k = jnp.pad(self.v_template.T,
                            ((0, 0), (0, padV))).reshape(1, 3 * Vp)      # (1,3Vp)
        self.w_t = jnp.pad(self.lbs_weights.T, ((0, 0), (0, padV)))      # (J, Vp)

        # one-hot corner gather slab, per-M-tile grouped as [c0|c1|c2] lanes
        tri = self.faces[self.nearest_face_id]                           # (M, 3)
        sel = jnp.stack(
            [jax.nn.one_hot(tri[:, c], Vp, dtype=jnp.float32).T
             for c in range(3)], axis=0)                                 # (3,Vp,M)
        sel = jnp.pad(sel, ((0, 0), (0, 0), (0, padM)))                  # (3,Vp,Mp)
        Mt = Mp // self.m_tile
        self.sel_k = jnp.transpose(
            sel.reshape(3, Vp, Mt, self.m_tile),
            (1, 2, 0, 3)).reshape(Vp, 3 * Mp).astype(jnp.bfloat16)       # (Vp,3Mp)

        # barycentric weights + projection distance packed into one operand
        wd = jnp.stack([self.weights_2d[:, 0], self.weights_2d[:, 1],
                        self.proj_dist], axis=0)                         # (3, M)
        self.wd_k = jnp.pad(wd, ((0, 0), (0, padM)))                     # (3, Mp)

        self.J_template = self.J_regressor @ self.v_template             # (J, 3)
        self.J_shapedirs = jnp.einsum('jv,vcl->jcl', self.J_regressor,
                                      self.shapedirs)                    # (J,3,NB)

    # forward: SMPL.forward + SurfaceField.deferred_projection
    def __call__(self, betas, body_pose, global_orient, transl):
        B = betas.shape[0]
        J, P = self.J, self.P
        full_pose = jnp.concatenate([global_orient, body_pose], axis=1)
        rot_mats = batch_rodrigues(full_pose.reshape(-1, 3)).reshape(B, J, 3, 3)
        pose_feature = (rot_mats[:, 1:] -
                        jnp.eye(3, dtype=jnp.float32)).reshape(B, P)
        joints = self.J_template[None] + jnp.einsum('bl,jcl->bjc', betas,
                                                    self.J_shapedirs)
        _, A = batch_rigid_transform(rot_mats, joints, self.parents)

        coeff = jnp.concatenate([betas, pose_feature], axis=1)       # (B, NB+P)
        coeff = jnp.pad(coeff, ((0, 0), (0, self.Kp - coeff.shape[1])))
        # amat rows ordered (4c+k)*B + b so the skinning slices are contiguous
        amat = jnp.transpose(A[:, :, :3, :], (2, 3, 0, 1)).reshape(12 * B, J)

        proj = smpl_forward_pallas(coeff, amat, self.vt_k, self.bd_k, self.w_t,
                                   self.sel_k, self.wd_k,
                                   m_tile=self.m_tile)               # (3B, Mp)
        proj = proj[:, :self.M].reshape(3, B, self.M)
        # transl folded in AFTER the kernel: deferred projection is exactly
        # translation-equivariant, and this keeps vertex magnitudes small for
        # the bf16 gather dot.
        return jnp.transpose(proj, (1, 2, 0)) + transl[:, None, :]   # (B, M, 3)

    # pure-JAX reference (mirrors the PyTorch semantics) for validation
    def reference(self, betas, body_pose, global_orient, transl):
        B = betas.shape[0]
        v_shaped = self.v_template[None] + jnp.einsum('bl,vcl->bvc', betas,
                                                      self.shapedirs)
        joints = jnp.einsum('jv,bvc->bjc', self.J_regressor, v_shaped)
        full_pose = jnp.concatenate([global_orient, body_pose], axis=1)
        rot_mats = batch_rodrigues(full_pose.reshape(-1, 3)).reshape(
            B, self.J, 3, 3)
        pose_feature = (rot_mats[:, 1:] -
                        jnp.eye(3, dtype=jnp.float32)).reshape(B, -1)
        pose_offsets = (pose_feature @ self.posedirs).reshape(B, self.V, 3)
        v_posed = v_shaped + pose_offsets
        _, A = batch_rigid_transform(rot_mats, joints, self.parents)
        T = jnp.einsum('vj,bjik->bvik', self.lbs_weights, A)
        v_h = jnp.concatenate(
            [v_posed, jnp.ones((B, self.V, 1), jnp.float32)], axis=2)
        verts = jnp.einsum('bvik,bvk->bvi', T, v_h)[..., :3] + transl[:, None]
        tri = verts[:, self.faces[self.nearest_face_id]]        # (B, M, 3, 3)
        v0, v1, v2 = tri[:, :, 0], tri[:, :, 1], tri[:, :, 2]
        e1, e2 = v1 - v0, v2 - v0
        p = (v0 + self.weights_2d[None, :, 0:1] * e1
             + self.weights_2d[None, :, 1:2] * e2)
        n = jnp.cross(e1, e2)
        n = n * lax.rsqrt(jnp.sum(n * n, axis=-1, keepdims=True) + 1e-12)
        return p + self.proj_dist[None, :, None] * n


if __name__ == "__main__":
    root = jax.random.PRNGKey(0)
    k_model, k1, k2, k3, k4 = jax.random.split(root, 5)

    B, V, F, M, J, NB = 2, 256, 512, 128, 8, 8
    model = SMPLSimplifiedPallas(k_model, V=V, F=F, M=M, J=J, NB=NB)

    betas = jax.random.normal(k1, (B, NB), jnp.float32)
    body_pose = 0.3 * jax.random.normal(k2, (B, 3 * (J - 1)), jnp.float32)
    global_orient = 0.3 * jax.random.normal(k3, (B, 3), jnp.float32)
    transl = jax.random.normal(k4, (B, 3), jnp.float32)

    out = jax.block_until_ready(model(betas, body_pose, global_orient, transl))
    ref = jax.block_until_ready(
        model.reference(betas, body_pose, global_orient, transl))

    assert out.shape == (B, M, 3)
    max_err = float(jnp.max(jnp.abs(out - ref)))
    if not np.isfinite(max_err) or max_err > 5e-2:
        raise AssertionError(f"mismatch vs reference: max_err={max_err}")
    print("KERNEL_OK")
</pallas_src>

<mosaic_0001>
module attributes {stable_mosaic.version = 11 : i64} {
  func.func @_smpl_fused_kernel(%arg0: i32, %arg1: memref<2x128xf32, #tpu.memory_space<vmem>>, %arg2: memref<24x8xf32, #tpu.memory_space<vmem>>, %arg3: memref<1x768xf32, #tpu.memory_space<vmem>>, %arg4: memref<128x768xbf16, #tpu.memory_space<vmem>>, %arg5: memref<8x256xf32, #tpu.memory_space<vmem>>, %arg6: memref<256x384xbf16, #tpu.memory_space<vmem>>, %arg7: memref<3x128xf32, #tpu.memory_space<vmem>>, %arg8: memref<6x128xf32, #tpu.memory_space<vmem>>, %arg9: memref<6x256xf32, #tpu.memory_space<vmem>>) attributes {dimension_semantics = [#tpu.dimension_semantics<arbitrary>], iteration_bounds = array<i64: 2>, scalar_prefetch = 0 : i64, scratch_operands = 1 : i64, tpu.core_type = #tpu.core_type<tc>, window_params = [{pipeline_mode = #tpu.pipeline_mode<synchronous>, transform_indices = @transform_0, window_bounds = array<i64: 2, 128>}, {pipeline_mode = #tpu.pipeline_mode<synchronous>, transform_indices = @transform_1, window_bounds = array<i64: 24, 8>}, {pipeline_mode = #tpu.pipeline_mode<synchronous>, transform_indices = @transform_2, window_bounds = array<i64: 1, 768>}, {pipeline_mode = #tpu.pipeline_mode<synchronous>, transform_indices = @transform_3, window_bounds = array<i64: 128, 768>}, {pipeline_mode = #tpu.pipeline_mode<synchronous>, transform_indices = @transform_4, window_bounds = array<i64: 8, 256>}, {transform_indices = @transform_5, window_bounds = array<i64: 256, 384>}, {transform_indices = @transform_6, window_bounds = array<i64: 3, 128>}, {transform_indices = @transform_7, window_bounds = array<i64: 6, 128>}]} {
    %c0_i32 = arith.constant 0 : i32
    %0 = arith.cmpi eq, %arg0, %c0_i32 : i32
    %1 = arith.extui %0 : i1 to i32
    %c0_i32_0 = arith.constant 0 : i32
    %2 = arith.cmpi ne, %1, %c0_i32_0 : i32
    scf.if %2 {
      %c0_11 = arith.constant 0 : index
      %c0_12 = arith.constant 0 : index
      %52 = vector.load %arg1[%c0_11, %c0_12] : memref<2x128xf32, #tpu.memory_space<vmem>>, vector<2x128xf32>
      %53 = arith.truncf %52 : vector<2x128xf32> to vector<2x128xbf16>
      %c0_13 = arith.constant 0 : index
      %c0_14 = arith.constant 0 : index
      %54 = vector.load %arg4[%c0_13, %c0_14] : memref<128x768xbf16, #tpu.memory_space<vmem>>, vector<128x768xbf16>
      %cst_15 = arith.constant dense<0.000000e+00> : vector<2x768xf32>
      %55 = tpu.matmul %53, %54, %cst_15 {dimension_numbers = #tpu.dot_dimension_numbers<[1], [0], [0], [1], [0, 0, 1, 1], [], []>} : vector<2x128xbf16>, vector<128x768xbf16>, vector<2x768xf32> -> vector<2x768xf32>
      %c0_16 = arith.constant 0 : index
      %c0_17 = arith.constant 0 : index
      %56 = vector.load %arg3[%c0_16, %c0_17] : memref<1x768xf32, #tpu.memory_space<vmem>>, vector<1x768xf32>
      %57 = vector.broadcast %56 : vector<1x768xf32> to vector<2x768xf32>
      %58 = arith.addf %57, %55 : vector<2x768xf32>
      %59 = vector.extract_strided_slice %58 {offsets = [0, 0], sizes = [2, 256], strides = [1, 1]} : vector<2x768xf32> to vector<2x256xf32>
      %60 = vector.extract_strided_slice %58 {offsets = [0, 256], sizes = [2, 256], strides = [1, 1]} : vector<2x768xf32> to vector<2x256xf32>
      %61 = vector.extract_strided_slice %58 {offsets = [0, 512], sizes = [2, 256], strides = [1, 1]} : vector<2x768xf32> to vector<2x256xf32>
      %c0_18 = arith.constant 0 : index
      %c0_19 = arith.constant 0 : index
      %62 = vector.load %arg2[%c0_18, %c0_19] : memref<24x8xf32, #tpu.memory_space<vmem>>, vector<24x8xf32>
      %c0_20 = arith.constant 0 : index
      %c0_21 = arith.constant 0 : index
      %63 = vector.load %arg5[%c0_20, %c0_21] : memref<8x256xf32, #tpu.memory_space<vmem>>, vector<8x256xf32>
      %cst_22 = arith.constant dense<0.000000e+00> : vector<24x256xf32>
      %64 = tpu.matmul %62, %63, %cst_22 {dimension_numbers = #tpu.dot_dimension_numbers<[1], [0], [0], [1], [0, 0, 1, 1], [], []>} : vector<24x8xf32>, vector<8x256xf32>, vector<24x256xf32> -> vector<24x256xf32>
      %65 = vector.extract_strided_slice %64 {offsets = [0, 0], sizes = [2, 256], strides = [1, 1]} : vector<24x256xf32> to vector<2x256xf32>
      %66 = arith.mulf %65, %59 : vector<2x256xf32>
      %67 = vector.extract_strided_slice %64 {offsets = [2, 0], sizes = [2, 256], strides = [1, 1]} : vector<24x256xf32> to vector<2x256xf32>
      %68 = arith.mulf %67, %60 : vector<2x256xf32>
      %69 = arith.addf %66, %68 : vector<2x256xf32>
      %70 = vector.extract_strided_slice %64 {offsets = [4, 0], sizes = [2, 256], strides = [1, 1]} : vector<24x256xf32> to vector<2x256xf32>
      %71 = arith.mulf %70, %61 : vector<2x256xf32>
      %72 = arith.addf %69, %71 : vector<2x256xf32>
      %73 = vector.extract_strided_slice %64 {offsets = [6, 0], sizes = [2, 256], strides = [1, 1]} : vector<24x256xf32> to vector<2x256xf32>
      %74 = arith.addf %72, %73 : vector<2x256xf32>
      %75 = vector.extract_strided_slice %64 {offsets = [8, 0], sizes = [2, 256], strides = [1, 1]} : vector<24x256xf32> to vector<2x256xf32>
      %76 = arith.mulf %75, %59 : vector<2x256xf32>
      %77 = vector.extract_strided_slice %64 {offsets = [10, 0], sizes = [2, 256], strides = [1, 1]} : vector<24x256xf32> to vector<2x256xf32>
      %78 = arith.mulf %77, %60 : vector<2x256xf32>
      %79 = arith.addf %76, %78 : vector<2x256xf32>
      %80 = vector.extract_strided_slice %64 {offsets = [12, 0], sizes = [2, 256], strides = [1, 1]} : vector<24x256xf32> to vector<2x256xf32>
      %81 = arith.mulf %80, %61 : vector<2x256xf32>
      %82 = arith.addf %79, %81 : vector<2x256xf32>
      %83 = vector.extract_strided_slice %64 {offsets = [14, 0], sizes = [2, 256], strides = [1, 1]} : vector<24x256xf32> to vector<2x256xf32>
      %84 = arith.addf %82, %83 : vector<2x256xf32>
      %85 = vector.extract_strided_slice %64 {offsets = [16, 0], sizes = [2, 256], strides = [1, 1]} : vector<24x256xf32> to vector<2x256xf32>
      %86 = arith.mulf %85, %59 : vector<2x256xf32>
      %87 = vector.extract_strided_slice %64 {offsets = [18, 0], sizes = [2, 256], strides = [1, 1]} : vector<24x256xf32> to vector<2x256xf32>
      %88 = arith.mulf %87, %60 : vector<2x256xf32>
      %89 = arith.addf %86, %88 : vector<2x256xf32>
      %90 = vector.extract_strided_slice %64 {offsets = [20, 0], sizes = [2, 256], strides = [1, 1]} : vector<24x256xf32> to vector<2x256xf32>
      %91 = arith.mulf %90, %61 : vector<2x256xf32>
      %92 = arith.addf %89, %91 : vector<2x256xf32>
      %93 = vector.extract_strided_slice %64 {offsets = [22, 0], sizes = [2, 256], strides = [1, 1]} : vector<24x256xf32> to vector<2x256xf32>
      %94 = arith.addf %92, %93 : vector<2x256xf32>
      %95 = tpu.concatenate %74, %84, %94 in 0 : vector<2x256xf32>, vector<2x256xf32>, vector<2x256xf32> -> vector<6x256xf32>
      %c0_23 = arith.constant 0 : index
      %c0_24 = arith.constant 0 : index
      %96 = vector.load %arg9[%c0_23, %c0_24] : memref<6x256xf32, #tpu.memory_space<vmem>>, vector<6x256xf32>
      tpu.vector_store %arg9[%c0_23, %c0_24], %95 {strides = array<i32>} : memref<6x256xf32, #tpu.memory_space<vmem>>, vector<6x256xf32>,
    } else {
    }
    %c0 = arith.constant 0 : index
    %c0_1 = arith.constant 0 : index
    %3 = vector.load %arg9[%c0, %c0_1] : memref<6x256xf32, #tpu.memory_space<vmem>>, vector<6x256xf32>
    %4 = arith.truncf %3 : vector<6x256xf32> to vector<6x256xbf16>
    %c0_2 = arith.constant 0 : index
    %c0_3 = arith.constant 0 : index
    %5 = vector.load %arg6[%c0_2, %c0_3] : memref<256x384xbf16, #tpu.memory_space<vmem>>, vector<256x384xbf16>
    %cst = arith.constant dense<0.000000e+00> : vector<6x384xf32>
    %6 = tpu.matmul %4, %5, %cst {dimension_numbers = #tpu.dot_dimension_numbers<[1], [0], [0], [1], [0, 0, 1, 1], [], []>} : vector<6x256xbf16>, vector<256x384xbf16>, vector<6x384xf32> -> vector<6x384xf32>
    %7 = vector.extract_strided_slice %6 {offsets = [0, 0], sizes = [6, 128], strides = [1, 1]} : vector<6x384xf32> to vector<6x128xf32>
    %8 = vector.extract_strided_slice %6 {offsets = [0, 128], sizes = [6, 128], strides = [1, 1]} : vector<6x384xf32> to vector<6x128xf32>
    %9 = vector.extract_strided_slice %6 {offsets = [0, 256], sizes = [6, 128], strides = [1, 1]} : vector<6x384xf32> to vector<6x128xf32>
    %10 = arith.subf %8, %7 : vector<6x128xf32>
    %11 = arith.subf %9, %7 : vector<6x128xf32>
    %c0_4 = arith.constant 0 : index
    %c0_5 = arith.constant 0 : index
    %12 = vector.load %arg7[%c0_4, %c0_5] : memref<3x128xf32, #tpu.memory_space<vmem>>, vector<1x128xf32>
    %c1 = arith.constant 1 : index
    %c0_6 = arith.constant 0 : index
    %13 = vector.load %arg7[%c1, %c0_6] : memref<3x128xf32, #tpu.memory_space<vmem>>, vector<1x128xf32>
    %c2 = arith.constant 2 : index
    %c0_7 = arith.constant 0 : index
    %14 = vector.load %arg7[%c2, %c0_7] : memref<3x128xf32, #tpu.memory_space<vmem>>, vector<1x128xf32>
    %15 = vector.broadcast %12 : vector<1x128xf32> to vector<6x128xf32>
    %16 = arith.mulf %15, %10 : vector<6x128xf32>
    %17 = arith.addf %7, %16 : vector<6x128xf32>
    %18 = vector.broadcast %13 : vector<1x128xf32> to vector<6x128xf32>
    %19 = arith.mulf %18, %11 : vector<6x128xf32>
    %20 = arith.addf %17, %19 : vector<6x128xf32>
    %21 = vector.extract_strided_slice %10 {offsets = [0, 0], sizes = [2, 128], strides = [1, 1]} : vector<6x128xf32> to vector<2x128xf32>
    %22 = vector.extract_strided_slice %10 {offsets = [2, 0], sizes = [2, 128], strides = [1, 1]} : vector<6x128xf32> to vector<2x128xf32>
    %23 = vector.extract_strided_slice %10 {offsets = [4, 0], sizes = [2, 128], strides = [1, 1]} : vector<6x128xf32> to vector<2x128xf32>
    %24 = vector.extract_strided_slice %11 {offsets = [0, 0], sizes = [2, 128], strides = [1, 1]} : vector<6x128xf32> to vector<2x128xf32>
    %25 = vector.extract_strided_slice %11 {offsets = [2, 0], sizes = [2, 128], strides = [1, 1]} : vector<6x128xf32> to vector<2x128xf32>
    %26 = vector.extract_strided_slice %11 {offsets = [4, 0], sizes = [2, 128], strides = [1, 1]} : vector<6x128xf32> to vector<2x128xf32>
    %27 = arith.mulf %22, %26 : vector<2x128xf32>
    %28 = arith.mulf %23, %25 : vector<2x128xf32>
    %29 = arith.subf %27, %28 : vector<2x128xf32>
    %30 = arith.mulf %23, %24 : vector<2x128xf32>
    %31 = arith.mulf %21, %26 : vector<2x128xf32>
    %32 = arith.subf %30, %31 : vector<2x128xf32>
    %33 = arith.mulf %21, %25 : vector<2x128xf32>
    %34 = arith.mulf %22, %24 : vector<2x128xf32>
    %35 = arith.subf %33, %34 : vector<2x128xf32>
    %36 = arith.mulf %29, %29 : vector<2x128xf32>
    %37 = arith.mulf %32, %32 : vector<2x128xf32>
    %38 = arith.addf %36, %37 : vector<2x128xf32>
    %39 = arith.mulf %35, %35 : vector<2x128xf32>
    %40 = arith.addf %38, %39 : vector<2x128xf32>
    %cst_8 = arith.constant 9.99999996E-13 : f32
    %41 = vector.broadcast %cst_8 : f32 to vector<2x128xf32>
    %42 = arith.addf %40, %41 : vector<2x128xf32>
    %43 = math.rsqrt %42 : vector<2x128xf32>
    %44 = vector.broadcast %14 : vector<1x128xf32> to vector<2x128xf32>
    %45 = arith.mulf %44, %43 : vector<2x128xf32>
    %46 = arith.mulf %29, %45 : vector<2x128xf32>
    %47 = arith.mulf %32, %45 : vector<2x128xf32>
    %48 = arith.mulf %35, %45 : vector<2x128xf32>
    %49 = tpu.concatenate %46, %47, %48 in 0 : vector<2x128xf32>, vector<2x128xf32>, vector<2x128xf32> -> vector<6x128xf32>
    %50 = arith.addf %20, %49 : vector<6x128xf32>
    %c0_9 = arith.constant 0 : index
    %c0_10 = arith.constant 0 : index
    %51 = vector.load %arg8[%c0_9, %c0_10] : memref<6x128xf32, #tpu.memory_space<vmem>>, vector<6x128xf32>
    tpu.vector_store %arg8[%c0_9, %c0_10], %50 {strides = array<i32>} : memref<6x128xf32, #tpu.memory_space<vmem>>, vector<6x128xf32>,
    return
  }
  func.func @transform_0(%arg0: i32) -> (i32, i32) {
    %c0_i32 = arith.constant 0 : i32
    %c0_i32_0 = arith.constant 0 : i32
    %c0_i32_1 = arith.constant 0 : i32
    return %c0_i32, %c0_i32_0 : i32, i32
  }
  func.func @transform_1(%arg0: i32) -> (i32, i32) {
    %c0_i32 = arith.constant 0 : i32
    %c0_i32_0 = arith.constant 0 : i32
    %c0_i32_1 = arith.constant 0 : i32
    return %c0_i32, %c0_i32_0 : i32, i32
  }
  func.func @transform_2(%arg0: i32) -> (i32, i32) {
    %c0_i32 = arith.constant 0 : i32
    %c0_i32_0 = arith.constant 0 : i32
    %c0_i32_1 = arith.constant 0 : i32
    return %c0_i32, %c0_i32_0 : i32, i32
  }
  func.func @transform_3(%arg0: i32) -> (i32, i32) {
    %c0_i32 = arith.constant 0 : i32
    %c0_i32_0 = arith.constant 0 : i32
    %c0_i32_1 = arith.constant 0 : i32
    return %c0_i32, %c0_i32_0 : i32, i32
  }
  func.func @transform_4(%arg0: i32) -> (i32, i32) {
    %c0_i32 = arith.constant 0 : i32
    %c0_i32_0 = arith.constant 0 : i32
    %c0_i32_1 = arith.constant 0 : i32
    return %c0_i32, %c0_i32_0 : i32, i32
  }
  func.func @transform_5(%arg0: i32) -> (i32, i32) {
    %c0_i32 = arith.constant 0 : i32
    %c0_i32_0 = arith.constant 0 : i32
    return %c0_i32, %arg0 : i32, i32
  }
  func.func @transform_6(%arg0: i32) -> (i32, i32) {
    %c0_i32 = arith.constant 0 : i32
    %c0_i32_0 = arith.constant 0 : i32
    return %c0_i32, %arg0 : i32, i32
  }
  func.func @transform_7(%arg0: i32) -> (i32, i32) {
    %c0_i32 = arith.constant 0 : i32
    %c0_i32_0 = arith.constant 0 : i32
    return %c0_i32, %arg0 : i32, i32
  }
}

</mosaic_0001>

<bundles_post_ra>
// kernel: tpu_custom_call.1
= control target key start
LH: loop header
LB: loop body
LE: loop exit
PB: predicated region body
PF: predicated region fallthrough
CT: control target
= control target key end

     0   :  { %12 = vsyncpa [#allocation4], 0  ;;  %s2423_s0 = inlined_call_operand.vmem [shape: f32[2,128], index: 0, kind: input, shape index: {}]   ;;  %s2424_s1 = inlined_call_operand.vmem [shape: f32[24,8], index: 1, kind: input, shape index: {}]   ;;  %s2425_s2 = inlined_call_operand.vmem [shape: f32[1,768], index: 2, kind: input, shape index: {}]   ;;  %s2426_s3 = inlined_call_operand.hbm [shape: bf16[128,768], index: 3, kind: input, shape index: {}]   ;;  %s2427_s4 = inlined_call_operand.vmem [shape: f32[8,256], index: 4, kind: input, shape index: {}]   ;;  %s2428_s5 = inlined_call_operand.hbm [shape: bf16[256,768], index: 5, kind: input, shape index: {}]   ;;  %s2429_s6 = inlined_call_operand.vmem [shape: f32[3,256], index: 6, kind: input, shape index: {}]   ;;  %s2430_s7 = inlined_call_operand.hbm [shape: f32[6,256], index: 7, kind: output, shape index: {}]  }
   0x1   :  { %13 = vsyncpa [#allocation7], 0 }
   0x2   :  { %15 = vsyncpa [#allocation7 + $0x1], 0 }
   0x3   :  { %16 = vsyncpa [#allocation5], 0 }
   0x4   :  { %18 = vsyncpa [#allocation5 + $0x1], 0  ;;  %s2115_s24 = smov 0   ;;  %s2117_s25 = smov 0  }
   0x5   :  { %s2119_s26 = smov 0   ;;  %s2121_s27 = smov 0  }
   0x6 LB: > { %s2136_s28 = sadd.s32 4294967295, %s2064_s27   ;;  %s1594_s29 = sadd.s32 4294967294, %s2064_s27   ;;  %s2064_s27 = sphi %s2121_s27, %s2459_s27   ;;  %s2060_s26 = sphi %s2119_s26, %s2458_s26   ;;  %s2056_s25 = sphi %s2117_s25, %s2457_s25   ;;  %s2052_s24 = sphi %s2115_s24, %s2456_s24  }
   0x7   : > { %s2140_s30 = sadd.s32 1, %s2064_s27   ;;  %s136_s8 = sadd.s32 1, %s2060_s26 }
   0x8   : > { %s133_s9 = ssub.s32 %s2064_s27, %s2140_s30  ;;  %p143_p0 = scmp.ne.s32.totalorder %s2060_s26, %s2056_s25 }
   0x9   : > { %p134_p1 = scmp.eq.s32.totalorder %s133_s9, 0  ;;  %p144_p2 = scmp.eq.s32.totalorder %s2064_s27, 0 }
   0xa   : > { %p149_p3 = scmp.ne.s32.totalorder %s2056_s25, %s2052_s24  ;;  %p2431_p4 = scmp.eq.s32.totalorder %s2136_s28, 0 }
   0xb   : > { %s2152_s10 = scalar_select %p134_p1, %s2060_s26, %s136_s8  }
   0xc   : > { %p2154_p5 = por %p144_p2, %p143_p0  ;;  %p2160_p6 = por %p2431_p4, %p149_p3 }
   0xd   : > { %2436 = sst [smem:[#allocation12_spill]] %s2152_s10  ;;  %p199_p7 = scmp.eq.s32.totalorder %s2136_s28, 1 }
   0xe   : > { %s2437_s11 = scalar_select %p2154_p5, 1, 0 }
   0xf   : > { %s2438_s12 = scalar_select %p2160_p6, 1, 0 }
  0x10   : > { %p205_p8 = scmp.eq.s32.totalorder %s1594_s29, 1  ;;  %p1595_p9 = scmp.ge.s32.totalorder %s2064_s27, 1 }
  0x11   : > { %p212_p10 = scmp.lt.s32.totalorder %s2064_s27, 3  ;;  %p2167_p11 = por %p199_p7, %p143_p0 }
  0x12   : > { %p2171_p12 = por %p205_p8, %p149_p3  ;;  %s2066_s16 = smov [#allocation3]  }
  0x13   : > { %s2439_s13 = scalar_select %p2167_p11, 1, 0 }
  0x14   : > { %s2440_s14 = scalar_select %p2171_p12, 1, 0 }
  0x15   : > { %p2175_p13 = pnand %p1595_p9, %p212_p10  ;;  %s233_s17 = sshll.u32 %s2066_s16, 4  ;;  %s234_s17 = int_to_ptr.vmem [resolvable:$true] %s233_s17 }
  0x16   : > { %s250_s19 = sand.u32 1, %s2060_s26   ;;  %s1936_s22 = scalar_lea.hbm %s2426_s3, 6144 }
  0x17   : > { %s2441_s15 = scalar_select %p2175_p13, 1, 0 }
  0x18   : > { %p1743_p2 = pneg %p2175_p13  ;;  %p1937_p8 = scmp.ne.s32.totalorder %s2426_s3, %s1936_s22 }
  0x1a   : > { %p2184_p0 = pnand %p1743_p2, %p2431_p4  ;;  %p1943_p2 = scmp.lt.u32.totalorder %s1936_s22, %s2426_s3 }
  0x1c   : > { %p1938_p9 = pneg %p2184_p0 }
  0x1e   : > { %p1939_p10 = pnand %p1938_p9, %p1937_p8 }
  0x20   : > { %p1940_p1 = pneg %p1939_p10 }
  0x22   : > { %p1945_p4 = pnand %p1943_p2, %p1940_p1 }
  0x24   : > { %1948 = shalt.err (!%p1945_p4)
}
  0x25   : > { %s1949_s16 = scalar_lea.vmem %s234_s17, 6144  ;;  %p1957_p11 = scmp.lt.s32.totalorder %s234_s17, %s234_s17 }
  0x26   : > { %p1950_p3 = scmp.ne.s32.totalorder %s234_s17, %s1949_s16  ;;  %p1958_p6 = scmp.lt.s32.totalorder %s1949_s16, %s1949_s16 }
  0x28   : > { %p1952_p7 = pnand %p1950_p3, %p1938_p9  ;;  %p1959_p13 = por %p1958_p6, %p1957_p11 }
  0x2a   : > { %p1953_p12 = pneg %p1952_p7 }
  0x2c   : > { %p1960_p5 = pnand %p1959_p13, %p1953_p12 }
  0x2e   : > { %1963 = shalt.err (!%p1960_p5)
}
  0x2f   : > { %s2435_s20 = smov 384   ;;  %s2068_s21 = smov 24  }
  0x30   : > { %1746 = dma.hbm_to_vmem [thread:$0]  (!%p2184_p0), %s2426_s3, 6144, %s234_s17, [#allocation4], %s2435_s20, %s2435_s20, %s2068_s21  }
  0x31   : > { %p2443_p4 = scmp.ne.s32.totalorder %s2437_s11, 0  ;;  %p2444_p1 = scmp.lt.s32.totalorder %s2064_s27, 2 }
  0x32   : > { %s1733_s8 = smul.u32 384, %s250_s19  ;;  %s2225_s21 = scalar_lea.sflag [#allocation7], %s250_s19 }
  0x33   : > { %p2213_p3 = pnand %p2444_p1, %p2443_p4  ;;  %s1710_s9 = smul.u32 192, %s2064_s27 }
  0x34   : > { %s254_s17 = scalar_lea.vmem [#allocation6], %s1733_s8 }
  0x35   : > { %s2221_s18 = scalar_lea.hbm %s2428_s5, %s1710_s9  ;;  %s261_s11 = sshll.u32 %s254_s17, 4  ;;  %s2223_s11 = int_to_ptr.vmem [resolvable:$true] %s261_s11 }
  0x36   : > { %s1964_s22 = scalar_lea.hbm %s2221_s18, 6144  ;;  %p1966_p6 = pneg %p2213_p3 }
  0x37   : > { %p1965_p5 = scmp.ne.s32.totalorder %s2221_s18, %s1964_s22  ;;  %s1969_s9 = scalar_lea.hbm %s2428_s5, 12288 }
  0x38   : > { %p1970_p13 = scmp.lt.u32.totalorder %s2221_s18, %s2428_s5  ;;  %p1971_p0 = scmp.lt.u32.totalorder %s1969_s9, %s1964_s22 }
  0x39   : > { %p1967_p11 = pnand %p1966_p6, %p1965_p5  ;;  %p1973_p8 = scmp.lt.u32.totalorder %s1964_s22, %s2221_s18 }
  0x3a   : > { %p1972_p7 = por %p1971_p0, %p1970_p13 }
  0x3b   : > { %p1968_p12 = pneg %p1967_p11 }
  0x3c   : > { %p1974_p9 = por %p1973_p8, %p1972_p7 }
  0x3e   : > { %p1975_p10 = pnand %p1974_p9, %p1968_p12 }
  0x40   : > { %1978 = shalt.err (!%p1975_p10)
}
  0x41   : > { %s1979_s19 = scalar_lea.vmem %s2223_s11, 6144  ;;  %s2069_s8 = smov [#allocation6]  }
  0x42   : > { %p1980_p2 = scmp.ne.s32.totalorder %s2223_s11, %s1979_s19  ;;  %s1984_s17 = sshll.u32 %s2069_s8, 4  ;;  %s1985_s17 = int_to_ptr.vmem [resolvable:$false] %s1984_s17 }
  0x43   : > { %s1986_s20 = scalar_lea.vmem %s1985_s17, 12288  ;;  %p1987_p5 = scmp.lt.s32.totalorder %s2223_s11, %s1985_s17 }
  0x44   : > { %p1982_p4 = pnand %p1980_p2, %p1966_p6  ;;  %p1988_p11 = scmp.lt.s32.totalorder %s1986_s20, %s1979_s19 }
  0x46   : > { %p1983_p1 = pneg %p1982_p4  ;;  %p1989_p13 = por %p1988_p11, %p1987_p5 }
  0x48   : > { %p1990_p0 = pnand %p1989_p13, %p1983_p1 }
  0x4a   : > { %1993 = shalt.err (!%p1990_p0)
}
  0x4b   : > { %s2070_s22 = smov 192   ;;  %s2071_s10 = smov 12  }
  0x4c   : > { %s2446_s23 = smov 384   ;;  %p2447_p6 = scmp.ne.s32.totalorder %s2441_s15, 0 }
  0x4d   : > { %1750 = dma.hbm_to_vmem [thread:$0]  (!%p2213_p3), %s2221_s18, 6144, %s2223_s11, %s2225_s21, %s2446_s23, %s2070_s22, %s2071_s10  }
  0x4e   : > { %280 = sbr.rel (%p2447_p6) target bundleno = 724 (0x2d4), region = 48  ;;  %p2448_p12 = scmp.eq.s32.totalorder (!%p2447_p6), %s2136_s28, 0 }
  0x55   : > { %2039 = dma.done.wait (%p2448_p12), [#allocation4], 6144   ;;  %p2449_p7 = pmov %p2448_p12 }
  0x56   : > { %s2261_s9 = sand.u32 1, %s2056_s25   ;;  %p2450_p3 = scmp.ne.s32.totalorder %s2438_s12, 0 }
  0x57   : > { %2041 = vsyncadd (%p2449_p7), [#allocation4], 4294961152  ;;  %s1734_s16 = smul.u32 384, %s2261_s9  ;;  %s287_s19 = scalar_lea.sflag [#allocation7], %s2261_s9 }
  0x59   : > { %s2265_s29 = scalar_lea.vmem [#allocation6], %s1734_s16 }
  0x5a   : > { %2043 = dma.done.wait (%p2450_p3), %s287_s19, 6144  }
  0x5b   : > { %2045 = vsyncadd (%p2450_p3), %s287_s19, 4294961152  ;;  %s1601_s15 = sshll.u32 %s2261_s9, 3  ;;  %p326_p8 = scmp.lt.s32.totalorder %s2136_s28, 1 }
  0x5c   : > { %s2279_s20 = scalar_lea.vmem [#allocation8], %s1601_s15  ;;  %p2451_p9 = scmp.ne.s32.totalorder %s2136_s28, 0 }
  0x5d   : > { %s327_s18 = scalar_select %p326_p8, %s2136_s28, 1 }
  0x5e   : > { %334 = sbr.rel (%p2451_p9) target bundleno = 390 (0x186), region = 60  ;;  %v1798_v0 = vld [vmem:[#allocation3 + $0x4] ss:$24 sps:$4 sm:$0xff] (!%p2451_p9)   ;;  %v2072_v2 = vmov (!%p2451_p9), 0   ;;  %v1802_v3 = vld [vmem:[#allocation3] ss:$24 sps:$4 sm:$0xff] (!%p2451_p9)   ;;  %v750_v57 = vlaneseq (!%p2451_p9) }
  0x5f   : > { %s1602_s11 = sshll.u32 %s327_s18, 2  ;;  %v1800_v1 = vld [vmem:[#allocation3 + $0xc] ss:$24 sps:$4 sm:$0xff] (!%p2451_p9)   ;;  %657 = vmatprep.mubr.bf16.mxu0 (!%p2451_p9), %v2072_v2  ;;  %698 = vmatprep.mubr.bf16.mxu1 (!%p2451_p9), %v2072_v2  ;;  %v1803_v4 = vld [vmem:[#allocation3 + $0x8] ss:$24 sps:$4 sm:$0xff] (!%p2451_p9)   ;;  %v790_v35 = vld [vmem:[%s2427_s4 + $0x8] sm:$0xff] (!%p2451_p9) }
  0x60   : > { %s2277_s17 = scalar_lea.vmem %s2429_s6, %s1602_s11  ;;  %625 = vmatprep.subr.bf16.mxu0 (!%p2451_p9), %v1798_v0  ;;  %666 = vmatprep.subr.bf16.mxu1 (!%p2451_p9), %v1800_v1  ;;  %v1804_v5 = vld [vmem:[#allocation3 + $0x34] ss:$24 sps:$4 sm:$0xff] (!%p2451_p9)   ;;  %v1808_v7 = vld [vmem:[#allocation3 + $0x30] ss:$24 sps:$4 sm:$0xff] (!%p2451_p9)   ;;  %v1810_v9 = vld [vmem:[#allocation3 + $0x64] ss:$24 sps:$4 sm:$0xff] (!%p2451_p9)  }
  0x61   : > { %626 = vmatpush1.bf16.msra.mxu0 (!%p2451_p9), %v1802_v3  ;;  %667 = vmatpush1.bf16.msra.mxu1 (!%p2451_p9), %v1803_v4  ;;  %v1806_v6 = vld [vmem:[#allocation3 + $0x3c] ss:$24 sps:$4 sm:$0xff] (!%p2451_p9)   ;;  %v1809_v8 = vld [vmem:[#allocation3 + $0x38] ss:$24 sps:$4 sm:$0xff] (!%p2451_p9)   ;;  %v1812_v10 = vld [vmem:[#allocation3 + $0x6c] ss:$24 sps:$4 sm:$0xff] (!%p2451_p9)  }
  0x62   : > { %627 = vmatprep.subr.bf16.mxu0 (!%p2451_p9), %v1804_v5  ;;  %668 = vmatprep.subr.bf16.mxu1 (!%p2451_p9), %v1806_v6  ;;  %v1814_v11 = vld [vmem:[#allocation3 + $0x60] ss:$24 sps:$4 sm:$0xff] (!%p2451_p9)   ;;  %v1816_v13 = vld [vmem:[#allocation3 + $0x94] ss:$24 sps:$4 sm:$0xff] (!%p2451_p9)   ;;  %v1820_v15 = vld [vmem:[#allocation3 + $0x90] ss:$24 sps:$4 sm:$0xff] (!%p2451_p9)  }
  0x63   : > { %v1815_v12 = vld [vmem:[#allocation3 + $0x68] ss:$24 sps:$4 sm:$0xff] (!%p2451_p9)   ;;  %v1818_v14 = vld [vmem:[#allocation3 + $0x9c] ss:$24 sps:$4 sm:$0xff] (!%p2451_p9)   ;;  %v1821_v16 = vld [vmem:[#allocation3 + $0x98] ss:$24 sps:$4 sm:$0xff] (!%p2451_p9)  }
  0x64   : > { %v1822_v17 = vld [vmem:[#allocation3 + $0xc4] ss:$24 sps:$4 sm:$0xff] (!%p2451_p9)   ;;  %v1826_v19 = vld [vmem:[#allocation3 + $0xc0] ss:$24 sps:$4 sm:$0xff] (!%p2451_p9)   ;;  %v1828_v21 = vld [vmem:[#allocation3 + $0xf4] ss:$24 sps:$4 sm:$0xff] (!%p2451_p9)  }
  0x65   : > { %628 = vmatpush1.bf16.msra.mxu0 %v1808_v7  ;;  %669 = vmatpush1.bf16.msra.mxu1 %v1809_v8  ;;  %v1824_v18 = vld [vmem:[#allocation3 + $0xcc] ss:$24 sps:$4 sm:$0xff]   ;;  %v1827_v20 = vld [vmem:[#allocation3 + $0xc8] ss:$24 sps:$4 sm:$0xff]   ;;  %v1830_v22 = vld [vmem:[#allocation3 + $0xfc] ss:$24 sps:$4 sm:$0xff]  }
  0x66   : > { %629 = vmatprep.subr.bf16.mxu0 %v1810_v9  ;;  %670 = vmatprep.subr.bf16.mxu1 %v1812_v10  ;;  %v1832_v23 = vld [vmem:[#allocation3 + $0xf0] ss:$24 sps:$4 sm:$0xff]   ;;  %v1834_v25 = vld [vmem:[#allocation3 + $0x124] ss:$24 sps:$4 sm:$0xff]   ;;  %v1838_v27 = vld [vmem:[#allocation3 + $0x120] ss:$24 sps:$4 sm:$0xff]  }
  0x67   : > { %v1833_v24 = vld [vmem:[#allocation3 + $0xf8] ss:$24 sps:$4 sm:$0xff]   ;;  %v1836_v26 = vld [vmem:[#allocation3 + $0x12c] ss:$24 sps:$4 sm:$0xff]   ;;  %v1839_v28 = vld [vmem:[#allocation3 + $0x128] ss:$24 sps:$4 sm:$0xff]  }
  0x68   : > { %v1840_v29 = vld [vmem:[#allocation3 + $0x154] ss:$24 sps:$4 sm:$0xff]   ;;  %v1844_v31 = vld [vmem:[#allocation3 + $0x150] ss:$24 sps:$4 sm:$0xff]   ;;  %v1851_v38 = vld [vmem:[#allocation3 + $0x44] ss:$24 sps:$4 sm:$0xff]  }
  0x69   : > { %630 = vmatpush1.bf16.msra.mxu0 %v1814_v11  ;;  %671 = vmatpush1.bf16.msra.mxu1 %v1815_v12  ;;  %v1842_v30 = vld [vmem:[#allocation3 + $0x15c] ss:$24 sps:$4 sm:$0xff]   ;;  %v1845_v32 = vld [vmem:[#allocation3 + $0x158] ss:$24 sps:$4 sm:$0xff]   ;;  %v2073_v41 = vmov 0.0   ;;  %vm791_vm0 = vcmask 64512  }
  0x6a   : > { %631 = vmatprep.subr.bf16.mxu0 %v1816_v13  ;;  %672 = vmatprep.subr.bf16.mxu1 %v1818_v14  ;;  %v335_v33 = vld [vmem:[%s2423_s0] sm:$0x3]  ;;  %v1848_v34 = vld [vmem:[#allocation3 + $0x14] ss:$24 sps:$4 sm:$0xff]   ;;  %v1849_v40 = vld [vmem:[#allocation3 + $0x40] ss:$24 sps:$4 sm:$0xff]  }
  0x6b   : > { %v336_v36 = vpack.c.bf16 %v335_v33, %v335_v33  ;;  %v1846_v37 = vld [vmem:[#allocation3 + $0x10] ss:$24 sps:$4 sm:$0xff]   ;;  %v1854_v42 = vld [vmem:[#allocation3 + $0x74] ss:$24 sps:$4 sm:$0xff]   ;;  %v1857_v45 = vld [vmem:[#allocation3 + $0xa4] ss:$24 sps:$4 sm:$0xff]  }
  0x6c   : > { %v789_v39 = vld [vmem:[%s2427_s4] sm:$0xff]  ;;  %v1855_v46 = vld [vmem:[#allocation3 + $0xa0] ss:$24 sps:$4 sm:$0xff]   ;;  %v1863_v51 = vld [vmem:[#allocation3 + $0x104] ss:$24 sps:$4 sm:$0xff]   ;;  %v751_v58 = vshrl.u32 %v750_v57, 7 }
  0x6d   : > { %632 = vmatpush1.bf16.msra.mxu0 %v1820_v15  ;;  %673 = vmatpush1.bf16.msra.mxu1 %v1821_v16  ;;  %v1852_v43 = vld [vmem:[#allocation3 + $0x70] ss:$24 sps:$4 sm:$0xff]   ;;  %v787_v47 = vld [vmem:[%s2424_s1 + $0x8] sm:$0xff]  ;;  %v1860_v48 = vld [vmem:[#allocation3 + $0xd4] ss:$24 sps:$4 sm:$0xff]   ;;  %vm998_vm1 = vcmask 1041408  }
  0x6e   : > { %633 = vmatprep.subr.bf16.mxu0 %v1822_v17  ;;  %674 = vmatprep.subr.bf16.mxu1 %v1824_v18  ;;  %v786_v44 = vld [vmem:[%s2424_s1] sm:$0xff]  ;;  %v788_v50 = vld [vmem:[%s2424_s1 + $0x10] sm:$0xff]  ;;  %v760_v59 = vsub.s32 2, %v751_v58  ;;  %v764_v60 = vsub.s32 3, %v751_v58  ;;  %v752_v0 = vsub.s32 0, %v751_v58  ;;  %vm1001_vm2 = vcmask 1043456  }
  0x6f   : > { %v1858_v49 = vld [vmem:[#allocation3 + $0xd0] ss:$24 sps:$4 sm:$0xff]   ;;  %v1861_v52 = vld [vmem:[#allocation3 + $0x100] ss:$24 sps:$4 sm:$0xff]   ;;  %v1866_v53 = vld [vmem:[#allocation3 + $0x134] ss:$24 sps:$4 sm:$0xff]  }
  0x70   : > { %v1864_v54 = vld [vmem:[#allocation3 + $0x130] ss:$24 sps:$4 sm:$0xff]   ;;  %v1869_v55 = vld [vmem:[#allocation3 + $0x164] ss:$24 sps:$4 sm:$0xff]   ;;  %v1867_v56 = vld [vmem:[#allocation3 + $0x160] ss:$24 sps:$4 sm:$0xff]  }
  0x71   : > { %634 = vmatpush1.bf16.msra.mxu0 %v1826_v19  ;;  %675 = vmatpush1.bf16.msra.mxu1 %v1827_v20  ;;  %v748_v61 = vld [vmem:[%s2425_s2] sm:$0x3f] }
  0x72   : > { %635 = vmatprep.subr.bf16.mxu0 %v1828_v21  ;;  %676 = vmatprep.subr.bf16.mxu1 %v1830_v22  ;;  %v761_v62 = vrot.slane %v748_v61, %v760_v59  ;;  %v765_v63 = vrot.slane %v748_v61, %v764_v60  ;;  %v753_v10 = vrot.slane %v748_v61, %v752_v0 }
  0x75   : > { %636 = vmatpush1.bf16.msra.mxu0 %v1832_v23  ;;  %677 = vmatpush1.bf16.msra.mxu1 %v1833_v24 }
  0x76   : > { %637 = vmatprep.subr.bf16.mxu0 %v1834_v25  ;;  %678 = vmatprep.subr.bf16.mxu1 %v1836_v26 }
  0x79   : > { %638 = vmatpush1.bf16.msra.mxu0 %v1838_v27  ;;  %679 = vmatpush1.bf16.msra.mxu1 %v1839_v28 }
  0x7a   : > { %639 = vmatprep.subr.bf16.mxu0 %v1840_v29  ;;  %680 = vmatprep.subr.bf16.mxu1 %v1842_v30 }
  0x7d   : > { %640 = vmatpush1.bf16.msra.mxu0 %v1844_v31  ;;  %681 = vmatpush1.bf16.msra.mxu1 %v1845_v32 }
  0x7e   : > { %707 = vmatprep.subr.bf16.mxu0 %v1848_v34  ;;  %801 = vmatprep.subr.mxu1 %v790_v35 }
  0x80   : > { %658 = vmatmul.mubr.bf16.vlgmr.msra.gmra.mrb[0].mxu0 %v336_v36  ;;  %699 = vmatmul.mubr.bf16.vlgmr.msra.gmra.mrb[0].mxu1 %v336_v36 }
  0x81   : > { %708 = vmatpush1.bf16.msra.mxu0 %v1846_v37  ;;  %802 = vmatpush1.msra.mxu1 %v789_v39 }
  0x82   : > { %709 = vmatprep.subr.bf16.mxu0 %v1851_v38  ;;  %865 = vmatprep.mubr.f32.mxu1 %v2073_v41 }
  0x83   : > { %739 = vmatprep.mubr.bf16.mxu0 %v2072_v2  ;;  %v756_v2 = vsub.s32 1, %v751_v58 }
  0x85   : > { %710 = vmatpush1.bf16.msra.mxu0 %v1849_v40  ;;  %v757_v13 = vrot.slane %v748_v61, %v756_v2 }
  0x86   : > { %711 = vmatprep.subr.bf16.mxu0 %v1854_v42 }
  0x88   : > { %1652 = vmatmul.mubr.msk.f32.vlgmr.msra.gmra.mrb[4].mxu1 %vm791_vm0, %v786_v44 }
  0x89   : > { %712 = vmatpush1.bf16.msra.mxu0 %v1852_v43  ;;  %871 = vmatprep.mubr.f32.mxu1 %v2073_v41 }
  0x8a   : > { %713 = vmatprep.subr.bf16.mxu0 %v1857_v45 }
  0x8c   : > { %1653 = vmatmul.mubr.msk.f32.gmra.mrb[6].mxu1 %vm791_vm0, %v787_v47 }
  0x8d   : > { %714 = vmatpush1.bf16.msra.mxu0 %v1855_v46  ;;  %877 = vmatprep.mubr.f32.mxu1 %v2073_v41 }
  0x8e   : > { %715 = vmatprep.subr.bf16.mxu0 %v1860_v48  ;;  %v768_v48 = vsub.s32 4, %v751_v58 }
  0x90   : > { %1654 = vmatmul.mubr.msk.f32.gmra.mrb[8].mxu1 %vm791_vm0, %v788_v50  ;;  %v769_v50 = vrot.slane %v748_v61, %v768_v48 }
  0x91   : > { %716 = vmatpush1.bf16.msra.mxu0 %v1858_v49  ;;  %v772_v49 = vsub.s32 5, %v751_v58 }
  0x92   : > { %717 = vmatprep.subr.bf16.mxu0 %v1863_v51 }
  0x93   : > { %v773_v51 = vrot.slane %v748_v61, %v772_v49 }
  0x95   : > { %718 = vmatpush1.bf16.msra.mxu0 %v1861_v52 }
  0x96   : > { %719 = vmatprep.subr.bf16.mxu0 %v1866_v53 }
  0x99   : > { %720 = vmatpush1.bf16.msra.mxu0 %v1864_v54 }
  0x9a   : > { %721 = vmatprep.subr.bf16.mxu0 %v1869_v55 }
  0x9d   : > { %722 = vmatpush1.bf16.msra.mxu0 %v1867_v56 }
  0xa0   : > { %740 = vmatmul.mubr.bf16.vlgmr.msra.gmra.mrb[4].mxu0 %v336_v36 }
 0x153   : > { %v659_v1 = vpop.f32.mrb[0].mxu0  ;;  %v700_v3 = vpop.f32.mrb[0].mxu1 }
 0x154   : > { %v661_v4 = vpop.f32.mrb[1].mxu0  ;;  %v782_v5 = vadd.f32 %v761_v62, %v700_v3  ;;  %v702_v6 = vpop.f32.mrb[1].mxu1  ;;  %v780_v16 = vadd.f32 %v753_v10, %v659_v1 }
 0x155   : > { %v663_v7 = vpop.f32.mrb[2].mxu0  ;;  %v783_v8 = vadd.f32 %v765_v63, %v702_v6  ;;  %v704_v9 = vpop.f32.mrb[2].mxu1  ;;  %v781_v17 = vadd.f32 %v757_v13, %v661_v4 }
 0x156   : > { %v664_v11 = vpop.f32.mrb[3].mxu0  ;;  %v705_v12 = vpop.f32.mrb[3].mxu1  ;;  %v888_v14 = vrot.slane %v782_v5, 6 }
 0x157   : > { %v889_v15 = vrot.slane %v783_v8, 6 }
 0x15b   : > { %v2310_v18 = vpop.f32.mrb[4].mxu1 }
 0x15c   : > { %v884_v19 = vmul.f32 %v2310_v18, %v780_v16  ;;  %v892_v20 = vmul.f32 %v888_v14, %v2310_v18  ;;  %v2314_v21 = vpop.f32.mrb[5].mxu1  ;;  %v920_v62 = vrot.slane %v2310_v18, 6 }
 0x15d   : > { %v885_v22 = vmul.f32 %v2314_v21, %v781_v17  ;;  %v893_v23 = vmul.f32 %v889_v15, %v2314_v21  ;;  %v921_v2 = vrot.slane %v2314_v21, 6 }
 0x15e   : > { %v896_v24 = vrot.slane %v892_v20, 2 }
 0x15f   : > { %v897_v25 = vrot.slane %v893_v23, 2  ;;  %v873_v26 = vpop.f32.mrb[6].mxu1 }
 0x160   : > { %v900_v27 = vadd.f32 %v896_v24, %v884_v19  ;;  %v926_v28 = vmul.f32 %v873_v26, %v780_v16  ;;  %v928_v29 = vmul.f32 %v888_v14, %v873_v26  ;;  %v875_v30 = vpop.f32.mrb[7].mxu1  ;;  %v950_v4 = vrot.slane %v873_v26, 6 }
 0x161   : > { %v901_v31 = vadd.f32 %v897_v25, %v885_v22  ;;  %v927_v32 = vmul.f32 %v875_v30, %v781_v17  ;;  %v929_v33 = vmul.f32 %v889_v15, %v875_v30  ;;  %v951_v8 = vrot.slane %v875_v30, 6 }
 0x162   : > { %v932_v34 = vrot.slane %v928_v29, 2 }
 0x163   : > { %v933_v35 = vrot.slane %v929_v33, 2  ;;  %v879_v36 = vpop.f32.mrb[8].mxu1 }
 0x164   : > { %v936_v37 = vadd.f32 %v932_v34, %v926_v28  ;;  %v956_v38 = vmul.f32 %v879_v36, %v780_v16  ;;  %v958_v39 = vmul.f32 %v888_v14, %v879_v36  ;;  %v881_v40 = vpop.f32.mrb[9].mxu1  ;;  %v980_v12 = vrot.slane %v879_v36, 6 }
 0x165   : > { %v937_v41 = vadd.f32 %v933_v35, %v927_v32  ;;  %v957_v42 = vmul.f32 %v881_v40, %v781_v17  ;;  %v959_v43 = vmul.f32 %v889_v15, %v881_v40  ;;  %v981_v16 = vrot.slane %v881_v40, 6 }
 0x166   : > { %v962_v44 = vrot.slane %v958_v39, 2 }
 0x167   : > { %v963_v45 = vrot.slane %v959_v43, 2 }
 0x168   : > { %v966_v46 = vadd.f32 %v962_v44, %v956_v38 }
 0x169   : > { %v967_v47 = vadd.f32 %v963_v45, %v957_v42 }
 0x173   : > { %v741_v52 = vpop.f32.mrb[4].mxu0 }
 0x174   : > { %v784_v53 = vadd.f32 %v769_v50, %v741_v52  ;;  %v743_v54 = vpop.f32.mrb[5].mxu0 }
 0x175   : > { %v785_v55 = vadd.f32 %v773_v51, %v743_v54  ;;  %v745_v56 = vpop.f32.mrb[6].mxu0 }
 0x176   : > { %v904_v57 = vrot.slane %v784_v53, 4  ;;  %v746_v59 = vpop.f32.mrb[7].mxu0 }
 0x177   : > { %v905_v60 = vrot.slane %v785_v55, 4 }
 0x178   : > { %v908_v63 = vmul.f32 %v904_v57, %v2310_v18  ;;  %v938_v0 = vmul.f32 %v904_v57, %v873_v26  ;;  %v968_v1 = vmul.f32 %v904_v57, %v879_v36 }
 0x179   : > { %v909_v58 = vmul.f32 %v905_v60, %v2314_v21  ;;  %v939_v3 = vmul.f32 %v905_v60, %v875_v30  ;;  %v969_v61 = vmul.f32 %v905_v60, %v881_v40 }
 0x17a   : > { %v912_v5 = vrot.slane %v908_v63, 4  ;;  %v942_v6 = vrot.slane %v938_v0, 4  ;;  %v972_v7 = vrot.slane %v968_v1, 4 }
 0x17b   : > { %v913_v9 = vrot.slane %v909_v58, 4  ;;  %v943_v10 = vrot.slane %v939_v3, 4  ;;  %v973_v11 = vrot.slane %v969_v61, 4 }
 0x17c   : > { %v916_v13 = vadd.f32 %v912_v5, %v900_v27  ;;  %v946_v14 = vadd.f32 %v942_v6, %v936_v37  ;;  %v976_v15 = vadd.f32 %v972_v7, %v966_v46 }
 0x17d   : > { %v917_v17 = vadd.f32 %v913_v9, %v901_v31  ;;  %v947_v18 = vadd.f32 %v943_v10, %v937_v41  ;;  %v977_v19 = vadd.f32 %v973_v11, %v967_v47 }
 0x17e   : > { %v924_v20 = vadd.f32 %v920_v62, %v916_v13  ;;  %v954_v21 = vadd.f32 %v950_v4, %v946_v14  ;;  %v984_v22 = vadd.f32 %v980_v12, %v976_v15 }
 0x17f   : > { %v925_v23 = vadd.f32 %v921_v2, %v917_v17  ;;  %v955_v24 = vadd.f32 %v951_v8, %v947_v18  ;;  %v985_v25 = vadd.f32 %v981_v16, %v977_v19 }
 0x180   : > { %v988_v26 = vrot.slane %v954_v21, 6  ;;  %v994_v28 = vrot.slane %v984_v22, 4 }
 0x181   : > { %v989_v29 = vrot.slane %v955_v24, 6  ;;  %v995_v30 = vrot.slane %v985_v25, 4 }
 0x182   : > { %v999_v32 = vsel %vm998_vm1, %v924_v20, %v988_v26 }
 0x183   : > { %v1002_v27 = vsel %vm1001_vm2, %v999_v32, %v994_v28  ;;  %v1000_v33 = vsel %vm998_vm1, %v925_v23, %v989_v29 }
 0x184   : > { %1004 = vst [vmem:[#allocation2] sm:$0x3f] %v1002_v27  ;;  %v1003_v34 = vsel %vm1001_vm2, %v1000_v33, %v995_v30 }
 0x185   : > { %1005 = vst [vmem:[#allocation2 + $0x8] sm:$0x3f] %v1003_v34 }
 0x186 PF: > { %v1870_v31 = vld [vmem:[%s2265_s29 + $0x4] ss:$12 sps:$4 sm:$0xff]   ;;  %v1872_v35 = vld [vmem:[%s2265_s29] ss:$12 sps:$4 sm:$0xff]   ;;  %v1873_v36 = vld [vmem:[%s2265_s29 + $0x1c] ss:$12 sps:$4 sm:$0xff]  }
 0x187   : > { %1330 = vmatprep.subr.bf16.mxu0 %v1870_v31  ;;  %v1875_v37 = vld [vmem:[%s2265_s29 + $0x18] ss:$12 sps:$4 sm:$0xff]   ;;  %v1876_v38 = vld [vmem:[%s2265_s29 + $0x34] ss:$12 sps:$4 sm:$0xff]   ;;  %v1878_v39 = vld [vmem:[%s2265_s29 + $0x30] ss:$12 sps:$4 sm:$0xff]  }
 0x188   : > { %1331 = vmatpush1.bf16.msra.mxu0 %v1872_v35  ;;  %v1879_v40 = vld [vmem:[%s2265_s29 + $0x4c] ss:$12 sps:$4 sm:$0xff]   ;;  %v1881_v41 = vld [vmem:[%s2265_s29 + $0x48] ss:$12 sps:$4 sm:$0xff]   ;;  %v1882_v44 = vld [vmem:[%s2265_s29 + $0x64] ss:$12 sps:$4 sm:$0xff]  }
 0x189   : > { %1332 = vmatprep.subr.bf16.mxu0 %v1873_v36  ;;  %v1891_v42 = vld [vmem:[%s2265_s29 + $0xc8] ss:$12 sps:$4 sm:$0xff]   ;;  %v1896_v45 = vld [vmem:[%s2265_s29 + $0xe0] ss:$12 sps:$4 sm:$0xff]   ;;  %v1901_v49 = vld [vmem:[%s2265_s29 + $0xf8] ss:$12 sps:$4 sm:$0xff]  }
 0x18a   : > { %v1892_v43 = vld [vmem:[%s2265_s29 + $0x8] ss:$12 sps:$4 sm:$0xff]   ;;  %1711 = vmatprep.subr.bf16.mxu1 %v1891_v42  ;;  %v1897_v46 = vld [vmem:[%s2265_s29 + $0x20] ss:$12 sps:$4 sm:$0xff]   ;;  %v1902_v50 = vld [vmem:[%s2265_s29 + $0x38] ss:$12 sps:$4 sm:$0xff]  }
 0x18b   : > { %1712 = vmatpush3.bf16.msra.mxu1 %v1892_v43  ;;  %v1884_v47 = vld [vmem:[%s2265_s29 + $0x60] ss:$12 sps:$4 sm:$0xff]   ;;  %v1885_v48 = vld [vmem:[%s2265_s29 + $0x7c] ss:$12 sps:$4 sm:$0xff]   ;;  %v1887_v51 = vld [vmem:[%s2265_s29 + $0x78] ss:$12 sps:$4 sm:$0xff]  }
 0x18c   : > { %1333 = vmatpush1.bf16.msra.mxu0 %v1875_v37  ;;  %1713 = vmatprep.subr.bf16.mxu1 %v1896_v45  ;;  %v1888_v52 = vld [vmem:[%s2265_s29 + $0x94] ss:$12 sps:$4 sm:$0xff]   ;;  %v1906_v53 = vld [vmem:[%s2265_s29 + $0x110] ss:$12 sps:$4 sm:$0xff]   ;;  %v1893_v57 = vld [vmem:[%s2265_s29 + $0xac] ss:$12 sps:$4 sm:$0xff]  }
 0x18d   : > { %1334 = vmatprep.subr.bf16.mxu0 %v1876_v38  ;;  %v1907_v54 = vld [vmem:[%s2265_s29 + $0x50] ss:$12 sps:$4 sm:$0xff]   ;;  %v1911_v56 = vld [vmem:[%s2265_s29 + $0x128] ss:$12 sps:$4 sm:$0xff]   ;;  %v1916_v60 = vld [vmem:[%s2265_s29 + $0x140] ss:$12 sps:$4 sm:$0xff]  }
 0x18e   : > { %v1890_v55 = vld [vmem:[%s2265_s29 + $0x90] ss:$12 sps:$4 sm:$0xff]   ;;  %v1912_v59 = vld [vmem:[%s2265_s29 + $0x68] ss:$12 sps:$4 sm:$0xff]   ;;  %v1917_v0 = vld [vmem:[%s2265_s29 + $0x80] ss:$12 sps:$4 sm:$0xff]  }
 0x18f   : > { %1714 = vmatpush3.bf16.msra.mxu1 %v1897_v46  ;;  %v1895_v62 = vld [vmem:[%s2265_s29 + $0xa8] ss:$12 sps:$4 sm:$0xff]   ;;  %v1898_v63 = vld [vmem:[%s2265_s29 + $0xc4] ss:$12 sps:$4 sm:$0xff]   ;;  %v1900_v2 = vld [vmem:[%s2265_s29 + $0xc0] ss:$12 sps:$4 sm:$0xff]  }
 0x190   : > { %1335 = vmatpush1.bf16.msra.mxu0 %v1878_v39  ;;  %1715 = vmatprep.subr.bf16.mxu1 %v1901_v49  ;;  %v1921_v1 = vld [vmem:[%s2265_s29 + $0x158] ss:$12 sps:$4 sm:$0xff]   ;;  %v1903_v58 = vld [vmem:[%s2265_s29 + $0xdc] ss:$12 sps:$4 sm:$0xff]   ;;  %v1908_v5 = vld [vmem:[%s2265_s29 + $0xf4] ss:$12 sps:$4 sm:$0xff]  }
 0x191   : > { %1336 = vmatprep.subr.bf16.mxu0 %v1879_v40  ;;  %v1922_v3 = vld [vmem:[%s2265_s29 + $0x98] ss:$12 sps:$4 sm:$0xff]   ;;  %v1926_v61 = vld [vmem:[%s2265_s29 + $0x170] ss:$12 sps:$4 sm:$0xff]   ;;  %v1915_v13 = vld [vmem:[%s2265_s29 + $0x108] ss:$12 sps:$4 sm:$0xff]  }
 0x192   : > { %v1905_v4 = vld [vmem:[%s2265_s29 + $0xd8] ss:$12 sps:$4 sm:$0xff]   ;;  %v1927_v7 = vld [vmem:[%s2265_s29 + $0xb0] ss:$12 sps:$4 sm:$0xff]   ;;  %v1920_v15 = vld [vmem:[%s2265_s29 + $0x120] ss:$12 sps:$4 sm:$0xff]  }
 0x193   : > { %1716 = vmatpush3.bf16.msra.mxu1 %v1902_v50  ;;  %v1007_v6 = vld [vmem:[#allocation2 + $0x8] sm:$0x3f]  ;;  %v1006_v9 = vld [vmem:[#allocation2] sm:$0x3f]  ;;  %vm1480_vm3 = vcmask 1041408   ;;  %vm1482_vm4 = vcmask 1043456  }
 0x194   : > { %1337 = vmatpush1.bf16.msra.mxu0 %v1881_v41  ;;  %1717 = vmatprep.subr.bf16.mxu1 %v1906_v53  ;;  %v1009_v8 = vpack.c.bf16 %v1007_v6, %v1007_v6  ;;  %v1910_v10 = vld [vmem:[%s2265_s29 + $0xf0] ss:$12 sps:$4 sm:$0xff]   ;;  %v1913_v11 = vld [vmem:[%s2265_s29 + $0x10c] ss:$12 sps:$4 sm:$0xff]   ;;  %v1008_v12 = vpack.c.bf16 %v1006_v9, %v1006_v9  ;;  %v1928_v18 = vld [vmem:[%s2265_s29 + $0x154] ss:$12 sps:$4 sm:$0xff]  }
 0x195   : > { %1338 = vmatprep.subr.bf16.mxu0 %v1882_v44  ;;  %v1918_v14 = vld [vmem:[%s2265_s29 + $0x124] ss:$12 sps:$4 sm:$0xff]   ;;  %v1923_v16 = vld [vmem:[%s2265_s29 + $0x13c] ss:$12 sps:$4 sm:$0xff]   ;;  %v1931_v20 = vld [vmem:[%s2265_s29 + $0x16c] ss:$12 sps:$4 sm:$0xff]  }
 0x196   : > { %1403 = vmatprep.mubr.bf16.mxu1 %v1009_v8  ;;  %1362 = vmatprep.mubr.bf16.mxu0 %v1009_v8  ;;  %v1925_v17 = vld [vmem:[%s2265_s29 + $0x138] ss:$12 sps:$4 sm:$0xff]   ;;  %v1930_v19 = vld [vmem:[%s2265_s29 + $0x150] ss:$12 sps:$4 sm:$0xff]   ;;  %v1933_v21 = vld [vmem:[%s2265_s29 + $0x168] ss:$12 sps:$4 sm:$0xff]  }
 0x197   : > { %1718 = vmatpush3.bf16.msra.mxu1 %v1907_v54  ;;  %v1703_v32 = vld [vmem:[%s2277_s17] ss:$0 sm:$0xff]  ;;  %v1704_v37 = vld [vmem:[%s2277_s17 + $0x1] ss:$0 sm:$0xff]  ;;  %s1707_s29 = sshll.u32 %s2136_s28, 7  ;;  %s1500_s23 = sshll.u32 %s2279_s20, 4  ;;  %s2380_s23 = int_to_ptr.vmem [resolvable:$true] %s1500_s23 }
 0x198   : > { %1339 = vmatpush1.bf16.msra.mxu0 %v1884_v47  ;;  %1719 = vmatprep.subr.bf16.mxu1 %v1911_v56  ;;  %v1705_v56 = vld [vmem:[%s2277_s17 + $0x2] ss:$0 sm:$0xff]  ;;  %s2378_s19 = scalar_lea.hbm %s2430_s7, %s1707_s29  ;;  %s1487_s15 = scalar_lea.sflag [#allocation5], %s2261_s9 }
 0x199   : > { %1340 = vmatprep.subr.bf16.mxu0 %v1885_v48  ;;  %s1994_s18 = scalar_lea.vmem %s2380_s23, 128  ;;  %p2452_p2 = scmp.ne.s32.totalorder %s2439_s13, 0 }
 0x19a   : > { %p1995_p10 = scmp.ne.s32.totalorder %s2380_s23, %s1994_s18  ;;  %s2074_s28 = smov [#allocation8]  }
 0x19b   : > { %1720 = vmatpush3.bf16.msra.mxu1 %v1912_v59  ;;  %s1998_s11 = sshll.u32 %s2074_s28, 4  ;;  %s1999_s11 = int_to_ptr.vmem [resolvable:$false] %s1998_s11 }
 0x19c   : > { %1341 = vmatpush1.bf16.msra.mxu0 %v1887_v51  ;;  %1721 = vmatprep.subr.bf16.mxu1 %v1916_v60  ;;  %p1996_p4 = pnand %p1995_p10, %p2452_p2  ;;  %s2000_s21 = scalar_lea.vmem %s1999_s11, 256 }
 0x19d   : > { %1342 = vmatprep.subr.bf16.mxu0 %v1888_v52  ;;  %p2001_p5 = scmp.lt.s32.totalorder %s2380_s23, %s1999_s11  ;;  %p2002_p11 = scmp.lt.s32.totalorder %s2000_s21, %s1994_s18 }
 0x19e   : > { %p1997_p1 = pneg %p1996_p4 }
 0x19f   : > { %1722 = vmatpush3.bf16.msra.mxu1 %v1917_v0  ;;  %p2003_p13 = por %p2002_p11, %p2001_p5 }
 0x1a0   : > { %1343 = vmatpush1.bf16.msra.mxu0 %v1890_v55  ;;  %1723 = vmatprep.subr.bf16.mxu1 %v1921_v1 }
 0x1a1   : > { %1344 = vmatprep.subr.bf16.mxu0 %v1893_v57  ;;  %p2004_p0 = pnand %p2003_p13, %p1997_p1 }
 0x1a3   : > { %1724 = vmatpush3.bf16.msra.mxu1 %v1922_v3 }
 0x1a4   : > { %1345 = vmatpush1.bf16.msra.mxu0 %v1895_v62  ;;  %1725 = vmatprep.subr.bf16.mxu1 %v1926_v61 }
 0x1a5   : > { %1346 = vmatprep.subr.bf16.mxu0 %v1898_v63 }
 0x1a7   : > { %1726 = vmatpush3.bf16.msra.mxu1 %v1927_v7 }
 0x1a8   : > { %1347 = vmatpush1.bf16.msra.mxu0 %v1900_v2 }
 0x1a9   : > { %1348 = vmatprep.subr.bf16.mxu0 %v1903_v58 }
 0x1aa   : > { %1404 = vmatmul.mubr.bf16.vlgmr.msra.gmra.mrb[0].mxu1 %v1008_v12 }
 0x1ac   : > { %1349 = vmatpush1.bf16.msra.mxu0 %v1905_v4 }
 0x1ad   : > { %1350 = vmatprep.subr.bf16.mxu0 %v1908_v5 }
 0x1b0   : > { %1351 = vmatpush1.bf16.msra.mxu0 %v1910_v10 }
 0x1b1   : > { %1352 = vmatprep.subr.bf16.mxu0 %v1913_v11 }
 0x1b4   : > { %1353 = vmatpush1.bf16.msra.mxu0 %v1915_v13 }
 0x1b5   : > { %1354 = vmatprep.subr.bf16.mxu0 %v1918_v14 }
 0x1b8   : > { %1355 = vmatpush1.bf16.msra.mxu0 %v1920_v15 }
 0x1b9   : > { %1356 = vmatprep.subr.bf16.mxu0 %v1923_v16 }
 0x1bc   : > { %1357 = vmatpush1.bf16.msra.mxu0 %v1925_v17 }
 0x1bd   : > { %1358 = vmatprep.subr.bf16.mxu0 %v1928_v18 }
 0x1c0   : > { %1359 = vmatpush1.bf16.msra.mxu0 %v1930_v19 }
 0x1c1   : > { %1360 = vmatprep.subr.bf16.mxu0 %v1931_v20 }
 0x1c4   : > { %1361 = vmatpush1.bf16.msra.mxu0 %v1933_v21 }
 0x1c7   : > { %1363 = vmatmul.mubr.bf16.vlgmr.msra.gmra.mrb[0].mxu0 %v1008_v12 }
 0x27d   : > { %v1727_v22 = vpop.f32.mrb[0].mxu1 }
 0x27e   : > { %v1728_v23 = vpop.f32.mrb[1].mxu1 }
 0x27f   : > { %v1729_v24 = vadd.f32 %v1728_v23, %v1727_v22  ;;  %v1730_v25 = vpop.f32.mrb[2].mxu1 }
 0x280   : > { %v1731_v26 = vpop.f32.mrb[3].mxu1 }
 0x29a   : > { %v1364_v28 = vpop.f32.mrb[0].mxu0 }
 0x29b   : > { %v1412_v29 = vsub.f32 %v1729_v24, %v1364_v28  ;;  %v1366_v30 = vpop.f32.mrb[1].mxu0 }
 0x29c   : > { %v1411_v27 = vsub.f32 %v1366_v30, %v1364_v28  ;;  %v1368_v33 = vpop.f32.mrb[2].mxu0 }
 0x29d   : > { %v1429_v34 = vrot.slane %v1412_v29, 2  ;;  %v1432_v31 = vrot.slane %v1412_v29, 6  ;;  %v1439_v35 = vrot.slane %v1412_v29, 4  ;;  %v1369_v36 = vpop.f32.mrb[3].mxu0  ;;  %v1426_v43 = vmul.f32 %v1704_v37, %v1412_v29 }
 0x29e   : > { %v1420_v38 = vmul.f32 %v1703_v32, %v1411_v27 }
 0x29f   : > { %v1431_v39 = vmul.f32 %v1429_v34, %v1411_v27  ;;  %v1434_v40 = vmul.f32 %v1432_v31, %v1411_v27  ;;  %v1441_v41 = vmul.f32 %v1439_v35, %v1411_v27 }
 0x2a0   : > { %v1421_v42 = vadd.f32 %v1420_v38, %v1364_v28 }
 0x2a1   : > { %v1436_v44 = vrot.slane %v1434_v40, 2  ;;  %v1443_v45 = vrot.slane %v1441_v41, 4 }
 0x2a2   : > { %v1427_v46 = vadd.f32 %v1426_v43, %v1421_v42 }
 0x2a3   : > { %v1438_v47 = vsub.f32 %v1431_v39, %v1436_v44  ;;  %v1445_v48 = vsub.f32 %v1441_v41, %v1443_v45 }
 0x2a5   : > { %v1446_v49 = vmul.f32 %v1438_v47, %v1438_v47  ;;  %v1447_v50 = vmul.f32 %v1445_v48, %v1445_v48 }
 0x2a7   : > { %v1449_v51 = vrot.slane %v1447_v50, 2  ;;  %v1453_v53 = vrot.slane %v1446_v49, 6 }
 0x2a9   : > { %v1451_v52 = vadd.f32 %v1449_v51, %v1446_v49 }
 0x2ab   : > { %v1455_v54 = vadd.f32 %v1453_v53, %v1451_v52 }
 0x2ad   : > { %v1456_v55 = vadd.f32 1e-12, %v1455_v54 }
 0x2af   : > { %1934 = vrsqrt.f32 %v1456_v55 }
 0x2b9   : > { %v1935_v57 = vpop.eup %1934 }
 0x2ba   : > { %v1462_v59 = vmul.f32 %v1935_v57, %v1705_v56 }
 0x2bc   : > { %v1463_v60 = vmul.f32 %v1462_v59, %v1438_v47  ;;  %v1465_v62 = vrot.slane %v1462_v59, 6  ;;  %v1468_v63 = vrot.slane %v1462_v59, 2 }
 0x2be   : > { %v1467_v0 = vmul.f32 %v1465_v62, %v1445_v48  ;;  %v1470_v1 = vmul.f32 %v1468_v63, %v1438_v47  ;;  %v1472_v2 = vrot.slane %v1463_v60, 2 }
 0x2c0   : > { %v1475_v58 = vrot.slane %v1467_v0, 2  ;;  %v1478_v3 = vrot.slane %v1470_v1, 4 }
 0x2c2   : > { %v1481_v61 = vsel %vm1480_vm3, %v1472_v2, %v1475_v58 }
 0x2c3   : > { %v1483_v4 = vsel %vm1482_vm4, %v1481_v61, %v1478_v3 }
 0x2c4   : > { %v1484_v5 = vadd.f32 %v1483_v4, %v1427_v46 }
 0x2c6   : > { %1485 = vst [vmem:[%s2279_s20] sm:$0x3f] %v1484_v5 }
 0x2c7   : > { %2007 = shalt.err (!%p2004_p0)
}
 0x2c8   : > { %s2008_s9 = scalar_lea.hbm %s2378_s19, 128  ;;  %s2012_s12 = scalar_lea.hbm %s2430_s7, 256 }
 0x2c9   : > { %p2009_p6 = scmp.ne.s32.totalorder %s2378_s19, %s2008_s9  ;;  %p2013_p3 = scmp.lt.u32.totalorder %s2378_s19, %s2430_s7 }
 0x2ca   : > { %p2014_p8 = scmp.lt.u32.totalorder %s2012_s12, %s2008_s9  ;;  %p2016_p10 = scmp.lt.u32.totalorder %s2008_s9, %s2378_s19 }
 0x2cb   : > { %p2010_p12 = pnand %p2009_p6, %p2452_p2 }
 0x2cc   : > { %p2015_p9 = por %p2014_p8, %p2013_p3 }
 0x2cd   : > { %p2011_p7 = pneg %p2010_p12 }
 0x2ce   : > { %p2017_p4 = por %p2016_p10, %p2015_p9 }
 0x2d0   : > { %p2018_p1 = pnand %p2017_p4, %p2011_p7 }
 0x2d2   : > { %2021 = shalt.err (!%p2018_p1)
}
 0x2d3   : > { %1741 = dma.vmem_to_hbm [thread:$0]  (%p2452_p2), %s2380_s23, 128, %s2378_s19, %s1487_s15  }
 0x2d4 PF: > { %s1512_s29 = sand.u32 1, %s2052_s24   ;;  %p2453_p5 = scmp.ne.s32.totalorder %s2440_s14, 0 }
 0x2d5   : > { %p2454_p11 = scmp.ge.s32.totalorder %s2064_s27, 2  ;;  %s1513_s17 = scalar_lea.sflag [#allocation5], %s1512_s29 }
 0x2d7   : > { %p1752_p13 = pnand %p2454_p11, %p2453_p5 }
 0x2d9   : > { %2047 = dma.done.wait (!%p1752_p13), %s1513_s17, 128  }
 0x2da   : > { %2049 = vsyncadd (!%p1752_p13), %s1513_s17, 4294967168  ;;  %s2455_s16 = sld [smem:[#allocation12_spill]]  ;;  %p21_p0 = scmp.ge.s32.totalorder %s2140_s30, 4  }
 0x2db   : > { %s2456_s24 = smov %s2056_s25  ;;  %s2457_s25 = smov %s2060_s26 }
 0x2dc   : > { %s2459_s27 = smov %s2140_s30  ;;  %23 = sbr.rel (!%p21_p0) target bundleno = 6 (0x6), region = 105 }
 0x2e0   : > { %s2458_s26 = smov %s2455_s16 }
 0x2e3   :  { %1518 = vsyncpa [#allocation4], 1 }
 0x2e4   :  { %1520 = vsyncpa [#allocation4 + $0x1], 1 }
 0x2e5   :  { %1521 = vsyncpa [#allocation7], 1 }
 0x2e6   :  { %1523 = vsyncpa [#allocation7 + $0x1], 1 }
 0x2e7   :  { %1524 = vsyncpa [#allocation5], 1 }
 0x2e8   :  { %1526 = vsyncpa [#allocation5 + $0x1], 1 }

</bundles_post_ra>
